<compile_context>
chip_gen: v7x
topology: tpu7x:2x2x1
jax: 0.10.0
libtpu: 0.0.40
codegen_flags: <defaults>
</compile_context>

<pallas_src>
import numpy as np
import jax
import jax.numpy as jnp
from jax import lax
from jax.experimental import pallas as pl
from jax.experimental.pallas import tpu as pltpu

# ---------------- configuration (small synthetic sizes) ----------------
OUT_CHANNEL = 32      # params['encoder']['out_channels']
HIDDEN      = 32      # params['decoder']['hidden_size']
INPUT_SIZE  = 32      # params['decoder']['input_size']  (== hidden, as in SAN configs)
ATTN_DIM    = 32      # params['attention']['attention_dim']
COVERAGE_CH = 512     # channels of the 11x11 coverage conv inside Attention
WORD_NUM    = 120     # must cover the struct-token ids 108..114
STRUCT_NUM  = 7
RATIO       = 16      # densenet ratio
THRESHOLD   = 0.5     # params['hybrid_tree']['threshold']
H, W        = 8, 8
L           = H * W
HALF        = HIDDEN // 2
GS          = 128     # lane-aligned GRU gate stride (each gate padded to one vreg block)
CTRL_W      = 128     # lane-dense control width (word id | valid | ... | struct sigmoids)
MAX_CHAIN   = 16      # decode steps executed on-device per pallas_call
MAX_TOTAL_STEPS = 200 # host-side safety cap for synthetic weights

VSPEC = pl.BlockSpec(memory_space=pltpu.MemorySpace.VMEM)
SSPEC = pl.BlockSpec(memory_space=pltpu.MemorySpace.SMEM)


# ======================= Pallas kernels =======================

def _init_hidden_kernel(featT_ref, mask_ref, w_ref, b_ref, out_ref):
    # featT (L, C), mask (1, L), w (C, HIDDEN), b (1, HIDDEN) -> out (1, HIDDEN)
    den = jnp.sum(mask_ref[...], axis=1, keepdims=True) + 1e-8      # eps guards all-zero masks
    avg = jnp.dot(mask_ref[...], featT_ref[...],
                  preferred_element_type=jnp.float32) / den          # (1, C)
    out_ref[...] = jnp.tanh(
        jnp.dot(avg, w_ref[...], preferred_element_type=jnp.float32) + b_ref[...])


def _gru(x, h, wi, wh, bi, bh):
    # PyTorch nn.GRUCell semantics; gates packed (r|z|n), one 128-lane block per gate.
    # Weights are bf16 (MXU), accumulation and gate math in f32 (VPU/EUP).
    gi = jnp.dot(x.astype(jnp.bfloat16), wi, preferred_element_type=jnp.float32) + bi
    gh = jnp.dot(h.astype(jnp.bfloat16), wh, preferred_element_type=jnp.float32) + bh
    r = jax.nn.sigmoid(gi[:, 0:HIDDEN] + gh[:, 0:HIDDEN])
    z = jax.nn.sigmoid(gi[:, GS:GS + HIDDEN] + gh[:, GS:GS + HIDDEN])
    n = jnp.tanh(gi[:, 2 * GS:2 * GS + HIDDEN] + r * gh[:, 2 * GS:2 * GS + HIDDEN])
    return (1.0 - z) * n + z * h


def _chain_kernel(wid_ref, state_in_ref, emb_ref, mask_ref, featT_ref, base_ref,
                  wi1_ref, wh1_ref, bi1_ref, bh1_ref,
                  whwb_ref, wfold_ref, wacb_ref,
                  wi2_ref, wh2_ref, bi2_ref, bh2_ref,
                  ws_ref, we_ref, wc_ref, bout_ref, wcat_ref, bcat_ref,
                  traj_ref, state_out_ref):
    """Runs up to MAX_CHAIN fused decode steps on device (one pallas_call per chain)."""
    lanes = lax.broadcasted_iota(jnp.int32, (1, CTRL_W), 1)
    word_lanes = lax.broadcasted_iota(jnp.int32, (1, WORD_NUM), 1).astype(jnp.float32)

    def step(t, carry):
        word_f, done, hid, asum = carry

        # ---- embedding lookup: one-hot matmul (table resident in VMEM for whole chain) ----
        onehot = (word_lanes == word_f).astype(jnp.bfloat16)                     # (1, WORD_NUM)
        emb = jnp.dot(onehot, emb_ref[...], preferred_element_type=jnp.float32)  # (1, INPUT)

        # ---- word_input_gru ----
        h1 = _gru(emb, hid, wi1_ref[...], wh1_ref[...], bi1_ref[...], bh1_ref[...])

        # ---- coverage attention (11x11 conv + projections pre-folded, flat (1, L*A) row) ----
        score = jnp.tanh(
            jnp.dot(h1.astype(jnp.bfloat16), whwb_ref[...],
                    preferred_element_type=jnp.float32)
            + jnp.dot(asum.astype(jnp.bfloat16), wfold_ref[...],
                      preferred_element_type=jnp.float32)
            + base_ref[...])                                                      # (1, L*A)
        energy = jnp.dot(score.astype(jnp.bfloat16), wacb_ref[...],
                         preferred_element_type=jnp.float32)                      # (1, L)
        # (the energy bias adds the same constant everywhere and cancels in softmax)
        mask = mask_ref[...]
        energy = energy + (mask - 1.0) * 1e9          # masked max: padding never dominates
        e = jnp.exp(energy - jnp.max(energy, axis=1, keepdims=True)) * mask
        alpha = e / (jnp.sum(e, axis=1, keepdims=True) + 1e-10)   # exact reciprocal (review)
        asum_new = asum + alpha
        ctx = jnp.dot(alpha.astype(jnp.bfloat16), featT_ref[...],
                      preferred_element_type=jnp.float32)                         # (1, C)

        # ---- word_out_gru ----
        h2 = _gru(ctx, h1, wi2_ref[...], wh2_ref[...], bi2_ref[...], bh2_ref[...])

        # ---- output heads (small, kept f32 for logit precision) ----
        out_state = (jnp.dot(h2, ws_ref[...], preferred_element_type=jnp.float32)
                     + jnp.dot(emb, we_ref[...], preferred_element_type=jnp.float32)
                     + jnp.dot(ctx, wc_ref[...], preferred_element_type=jnp.float32)
                     + bout_ref[...])                                              # (1, HALF)
        full = jnp.dot(out_state, wcat_ref[...],
                       preferred_element_type=jnp.float32) + bcat_ref[...]         # (1, 128)

        # ---- on-device argmax over word logits (lanes [0, WORD_NUM)) ----
        is_word = lanes < WORD_NUM
        wp = jnp.where(is_word, full, -1e30)
        m = jnp.max(wp, axis=1, keepdims=True)
        new_word = jnp.min(jnp.where((wp >= m) & is_word, lanes.astype(jnp.float32), 1e9),
                           axis=1, keepdims=True)                                  # (1, 1)

        # ---- trajectory row: lane0 word id, lane1 valid, lanes [120,127) struct sigmoids ----
        valid = 1.0 - done
        row = jnp.where((lanes >= WORD_NUM) & (lanes < WORD_NUM + STRUCT_NUM),
                        jax.nn.sigmoid(full), 0.0)
        row = jnp.where(lanes == 0, new_word, row)
        row = jnp.where(lanes == 1, valid, row)
        traj_ref[t] = row

        # ---- freeze the carried state once a terminal word (0 / 2) was produced ----
        term = ((new_word == 0.0) | (new_word == 2.0)).astype(jnp.float32)
        keep = done > 0.5
        return (jnp.where(keep, word_f, new_word),
                jnp.where(keep, done, term),
                jnp.where(keep, hid, h2),
                jnp.where(keep, asum, asum_new))

    word0 = jnp.full((1, 1), wid_ref[0], jnp.float32)
    hid0 = state_in_ref[:, 0:HIDDEN]
    asum0 = state_in_ref[:, HIDDEN:HIDDEN + L]
    carry = (word0, jnp.zeros((1, 1), jnp.float32), hid0, asum0)
    _, _, hid, asum = lax.fori_loop(0, MAX_CHAIN, step, carry)

    # packed lane-dense state out: [hidden | alpha_sum | pad]
    state_out_ref[...] = jnp.zeros_like(state_out_ref)
    state_out_ref[:, 0:HIDDEN] = hid
    state_out_ref[:, HIDDEN:HIDDEN + L] = asum


# ======================= pallas_call wrappers =======================

@jax.jit
def init_hidden_call(featT, mask_row, w, b):
    return pl.pallas_call(
        _init_hidden_kernel,
        out_shape=jax.ShapeDtypeStruct((1, HIDDEN), jnp.float32),
        in_specs=[VSPEC] * 4,
        out_specs=VSPEC,
    )(featT, mask_row, w, b)


@jax.jit
def chain_call(wid, state, sc):
    """One on-device decode chain: up to MAX_CHAIN fused steps, one readback per chain."""
    return pl.pallas_call(
        _chain_kernel,
        out_shape=(jax.ShapeDtypeStruct((MAX_CHAIN, 1, CTRL_W), jnp.float32),
                   jax.ShapeDtypeStruct((1, CTRL_W), jnp.float32)),
        in_specs=[SSPEC] + [VSPEC] * 22,
        out_specs=(VSPEC, VSPEC),
    )(wid, state, sc['emb'], sc['mask'], sc['featT'], sc['base'],
      sc['wi1'], sc['wh1'], sc['bi1'], sc['bh1'],
      sc['whw_big'], sc['wfold'], sc['wac_big'],
      sc['wi2'], sc['wh2'], sc['bi2'], sc['bh2'],
      sc['ws'], sc['we'], sc['wc'], sc['bout'], sc['wcat'], sc['bcat'])


# ======================= parameter construction =======================

def _linear(key, in_dim, out_dim, scale=0.1):
    k1, k2 = jax.random.split(key)
    wt = scale * jax.random.normal(k1, (in_dim, out_dim), jnp.float32)   # pre-transposed (in, out)
    b = scale * jax.random.normal(k2, (1, out_dim), jnp.float32)
    return wt, b


def _gru_fused(key, in_dim, hid, scale=0.1):
    # nn.GRUCell weights, pre-transposed and packed one gate (r|z|n) per 128-lane block.
    ks = jax.random.split(key, 4)

    def pack_w(k, rows):
        w = jnp.zeros((rows, 3 * GS), jnp.float32)
        gk = jax.random.split(k, 3)
        for g in range(3):
            w = w.at[:, g * GS:g * GS + hid].set(
                scale * jax.random.normal(gk[g], (rows, hid), jnp.float32))
        return w.astype(jnp.bfloat16)

    def pack_b(k):
        b = jnp.zeros((1, 3 * GS), jnp.float32)
        gk = jax.random.split(k, 3)
        for g in range(3):
            b = b.at[:, g * GS:g * GS + hid].set(
                scale * jax.random.normal(gk[g], (1, hid), jnp.float32))
        return b

    return dict(wi=pack_w(ks[0], in_dim), wh=pack_w(ks[1], hid),
                bi=pack_b(ks[2]), bh=pack_b(ks[3]))


def _attention_params(key, scale=0.1):
    # TODO(synk): the Attention module source is not in the prompt; the standard SAN
    # coverage attention (11x11 coverage conv + 1x1 feature projection) is assumed.
    ks = jax.random.split(key, 5)
    whw, bhw = _linear(ks[0], HIDDEN, ATTN_DIM)
    conv_w = scale * jax.random.normal(ks[1], (COVERAGE_CH, 1, 11, 11), jnp.float32)
    waw = scale * jax.random.normal(ks[2], (COVERAGE_CH, ATTN_DIM), jnp.float32)   # no bias
    wec, bec = _linear(ks[3], OUT_CHANNEL, ATTN_DIM)
    wac, bac = _linear(ks[4], ATTN_DIM, 1)
    return dict(whw=whw, bhw=bhw, conv_w=conv_w, waw=waw, wec=wec, bec=bec, wac=wac, bac=bac)


def _fold_attention(ap):
    """Fold the 11x11 coverage conv (pad=5 cross-correlation), the (512->A) coverage
    projection and the (A->1) energy projection into constants for the flat row layout:
      coverage[l, a] = sum_{l'} alpha_sum[l'] * W_cov[k(l,l'), a]
      W_cov[k, a]    = sum_c conv_w[c, 0, ky, kx] * waw[c, a],   k = ky*11 + kx
      k(l, l')       = (y'-y+5)*11 + (x'-x+5)   when |y'-y|<=5 and |x'-x|<=5
    Stored as bf16 MXU operands (halves the one-per-chain DMA and uses the bf16 fast path).
    """
    conv_w = np.asarray(ap['conv_w']).reshape(COVERAGE_CH, 11 * 11)
    w_cov = conv_w.T @ np.asarray(ap['waw'])                        # (121, A)
    wfold = np.zeros((L, L * ATTN_DIM), np.float32)
    for lp in range(L):
        yp, xp = divmod(lp, W)
        for l in range(L):
            y, x = divmod(l, W)
            dy, dx = yp - y, xp - x
            if -5 <= dy <= 5 and -5 <= dx <= 5:
                wfold[lp, l * ATTN_DIM:(l + 1) * ATTN_DIM] = w_cov[(dy + 5) * 11 + (dx + 5)]
    wac = np.asarray(ap['wac'])[:, 0]
    wac_big = np.zeros((L * ATTN_DIM, L), np.float32)
    for l in range(L):
        wac_big[l * ATTN_DIM:(l + 1) * ATTN_DIM, l] = wac
    whw_big = jnp.tile(ap['whw'], (1, L)).astype(jnp.bfloat16)      # (HIDDEN, L*A)
    return dict(whw_big=whw_big,
                wfold=jnp.asarray(wfold).astype(jnp.bfloat16),
                wac_big=jnp.asarray(wac_big).astype(jnp.bfloat16))


def init_params(key):
    ks = jax.random.split(key, 16)
    ws, bs = _linear(ks[0], HIDDEN, HALF)        # word_state_weight
    we, be = _linear(ks[1], HIDDEN, HALF)        # word_embedding_weight (input_size == hidden)
    wc, bc = _linear(ks[2], OUT_CHANNEL, HALF)   # word_context_weight
    wv, bv = _linear(ks[3], HALF, WORD_NUM)      # word_convert
    wst, bst = _linear(ks[4], HALF, STRUCT_NUM)  # struct_convert

    gru1 = _gru_fused(ks[7], INPUT_SIZE, HIDDEN)     # word_input_gru
    gru2 = _gru_fused(ks[8], OUT_CHANNEL, HIDDEN)    # word_out_gru
    att = _attention_params(ks[9])
    folds = _fold_attention(att)

    emb = 0.1 * jax.random.normal(ks[6], (WORD_NUM, INPUT_SIZE), jnp.float32)

    # lane-dense packed output head: [word_convert | struct_convert | 1 zero pad] -> 128 lanes
    wcat = jnp.concatenate([wv, wst, jnp.zeros((HALF, 1), jnp.float32)], axis=1)
    bcat = jnp.concatenate([bv, bst, jnp.zeros((1, 1), jnp.float32)], axis=1)

    step_consts = dict(
        emb=emb.astype(jnp.bfloat16),
        wi1=gru1['wi'], wh1=gru1['wh'], bi1=gru1['bi'], bh1=gru1['bh'],
        wi2=gru2['wi'], wh2=gru2['wh'], bi2=gru2['bi'], bh2=gru2['bh'],
        whw_big=folds['whw_big'], wfold=folds['wfold'], wac_big=folds['wac_big'],
        ws=ws, we=we, wc=wc, bout=bs + be + bc, wcat=wcat, bcat=bcat)

    P = {
        'init_weight': _linear(ks[5], OUT_CHANNEL, HIDDEN),
        'word_attention': att,
        'step_consts': step_consts,
        'words_index_dict': {i: "tok%d" % i for i in range(WORD_NUM)},
        # struc_input_gru / c2p_* parameters exist in __init__ but are unused in forward.
    }
    return P


# ======================= forward (host-side tree decode driving device chains) =======================

def san_decoder_forward(P, cnn_features, images_mask):
    # TODO(synk): the autoregressive tree decoding (string building, struct stack,
    # vocabulary dict lookups) is host-side Python control flow with no Pallas equivalent;
    # it now only intervenes at struct branches and drives the on-device chain kernel.
    height, width = cnn_features.shape[2:]
    mask_ds = images_mask[:, :, ::RATIO, ::RATIO]                      # (1,1,H,W)
    Lhw = height * width
    featT = jnp.transpose(cnn_features[0].reshape(OUT_CHANNEL, Lhw))   # (L, C)
    mask_row = mask_ds.reshape(1, Lhw)

    ap = P['word_attention']
    # one-time per-forward precompute (plain XLA): encoder-feature projection + query bias,
    # flattened to the (1, L*A) row layout of the fused kernel.
    base_flat = (featT @ ap['wec'] + ap['bec'] + ap['bhw']).reshape(1, Lhw * ATTN_DIM)

    sc = dict(P['step_consts'])
    sc.update(dict(mask=mask_row, featT=featT.astype(jnp.bfloat16), base=base_flat))

    parent_hidden = init_hidden_call(featT, mask_row,
                                     P['init_weight'][0], P['init_weight'][1])
    # packed device-resident state: [hidden | alpha_sum | pad] -> (1, 128)
    state = jnp.zeros((1, CTRL_W), jnp.float32)
    state = state.at[:, :HIDDEN].set(parent_hidden)

    struct_list = []          # (struct_word, packed_state, p_word, p_id) -- states stay on device
    prediction = ''
    right_brace = 0
    cid, pid = 0, 0
    p_id = 0                  # original leaves p_id undefined until the first plain word
    p_re = 'Start'
    word = 1
    result = [['<s>', 0, -1, 'root']]
    struct_dict = [108, 109, 110, 111, 112, 113, 114]
    widx = P['words_index_dict']

    total_steps = 0
    stop = False
    while not stop and len(prediction) < 400 and total_steps < MAX_TOTAL_STEPS:
        # ONE device dispatch + ONE small readback per chain of plain-word steps.
        traj, state = chain_call(jnp.asarray([word], dtype=jnp.int32), state, sc)
        traj_h = np.asarray(jax.device_get(traj))[:, 0, :]            # (MAX_CHAIN, 128)
        chain_word = word
        for t in range(MAX_CHAIN):
            if len(prediction) >= 400 or total_steps >= MAX_TOTAL_STEPS:
                stop = True
                break
            row = traj_h[t]
            if row[1] < 0.5:                    # this step was not executed on device
                break
            total_steps += 1
            p_word = chain_word
            word = int(round(float(row[0])))
            struct_sig = row[WORD_NUM:WORD_NUM + STRUCT_NUM]

            if word and word != 2:
                cid += 1
                p_id = cid
                result.append([widx[word], cid, pid, p_re])
                prediction = prediction + widx[word] + ' '
            if word == 2:
                for num in range(STRUCT_NUM - 1, -1, -1):
                    if float(struct_sig[num]) > THRESHOLD:
                        struct_list.append((struct_dict[num], state, p_word, p_id))
                if len(struct_list) == 0:
                    stop = True
                    break
                word, state, p_word, pid = struct_list.pop()
                if word == 110 or (word == 109 and p_word == 63):
                    prediction = prediction + '_ { '
                    p_re = 'Sub'
                    right_brace += 1
                elif word == 111 or (word == 108 and p_word == 63):
                    p_re = 'Sup'
                    prediction = prediction + '^ { '
                    right_brace += 1
                elif word == 108 and p_word == 14:
                    p_re = 'Above'
                    prediction = prediction + '{ '
                    right_brace += 1
                elif word == 109 and p_word == 14:
                    p_re = 'Below'
                    prediction = prediction + '{ '
                    right_brace += 1
                elif word == 112:
                    p_re = 'l_sup'
                    prediction = prediction + '[ '
                elif word == 113:
                    p_re = 'Inside'
                    prediction = prediction + '{ '
                    right_brace += 1
                break        # restart the device chain from the popped struct word / state
            elif word == 0:
                if len(struct_list) == 0:
                    if right_brace != 0:
                        for _ in range(right_brace):
                            prediction = prediction + '} '
                    stop = True
                    break
                word, state, p_word, pid = struct_list.pop()
                if word == 113:
                    prediction = prediction + '] { '
                    right_brace += 1
                    p_re = 'Inside'
                elif word == 110 or (word == 109 and p_word == 63):
                    p_re = 'Sub'
                    prediction += '} '
                    right_brace -= 1
                    if right_brace != 0:
                        for _ in range(right_brace):
                            prediction += '} '
                            right_brace -= 1
                    prediction = prediction + '_ { '
                    right_brace += 1
                elif word == 111 or (word == 108 and p_word == 63):
                    p_re = 'Sup'
                    prediction += '} '
                    right_brace -= 1
                    if right_brace != 0:
                        for _ in range(right_brace):
                            prediction += '} '
                            right_brace -= 1
                    prediction = prediction + '^ { '
                    right_brace += 1
                elif word == 108 and p_word == 14:
                    p_re = 'Above'
                    prediction += '} '
                    right_brace -= 1
                    if right_brace != 0:
                        for _ in range(right_brace):
                            prediction += '} '
                            right_brace -= 1
                    prediction = prediction + '{ '
                    right_brace += 1
                elif word == 109 and p_word == 14:
                    p_re = 'Below'
                    prediction += '} '
                    right_brace -= 1
                    if right_brace != 0:
                        for _ in range(right_brace):
                            prediction += '} '
                            right_brace -= 1
                    prediction = prediction + '{ '
                    right_brace += 1
                elif word == 112:
                    p_re = 'l_sup'
                    prediction = prediction + '[ '
                elif word == 113:
                    p_re = 'Inside'
                    prediction = prediction + '] { '
                    right_brace += 1
                elif word == 114:
                    p_re = 'Right'
                    prediction = prediction + '} '
                    right_brace -= 1
                break        # restart the device chain from the popped struct word / state
            else:
                # plain word: the device chain already continued with parent_hidden = hidden
                p_re = 'Right'
                pid = cid
                chain_word = word
        # chain exhausted without a terminal word: continue the same chain (word, state carry over)

    return result, state


# ======================= main =======================

if __name__ == "__main__":
    key = jax.random.PRNGKey(0)
    kp, kf = jax.random.split(key, 2)
    P = init_params(kp)

    cnn_features = jax.random.normal(kf, (1, OUT_CHANNEL, H, W), jnp.float32)
    images_mask = jnp.ones((1, 1, H * RATIO, W * RATIO), jnp.float32)
    # zero out the rightmost columns so the masked softmax / masked average is exercised
    images_mask = images_mask.at[:, :, :, (W - 2) * RATIO:].set(0.0)

    result, state = san_decoder_forward(P, cnn_features, images_mask)
    jax.block_until_ready(state)
    print("KERNEL_OK")
</pallas_src>

<mosaic_0001>
module attributes {stable_mosaic.version = 11 : i64} {
  func.func @_init_hidden_kernel(%arg0: memref<64x32xf32, #tpu.memory_space<vmem>>, %arg1: memref<1x64xf32, #tpu.memory_space<vmem>>, %arg2: memref<32x32xf32, #tpu.memory_space<vmem>>, %arg3: memref<1x32xf32, #tpu.memory_space<vmem>>, %arg4: memref<1x32xf32, #tpu.memory_space<vmem>>) attributes {dimension_semantics = [], scalar_prefetch = 0 : i64, scratch_operands = 0 : i64, tpu.core_type = #tpu.core_type<tc>} {
    %c0 = arith.constant 0 : index
    %c0_0 = arith.constant 0 : index
    %0 = vector.load %arg1[%c0, %c0_0] : memref<1x64xf32, #tpu.memory_space<vmem>>, vector<1x64xf32>
    %cst = arith.constant dense<0.000000e+00> : vector<1xf32>
    %1 = vector.multi_reduction <add>, %0, %cst [1] : vector<1x64xf32> to vector<1xf32>
    %2 = vector.shape_cast %1 : vector<1xf32> to vector<1x1xf32>
    %cst_1 = arith.constant 9.99999993E-9 : f32
    %3 = vector.broadcast %cst_1 : f32 to vector<1x1xf32>
    %4 = arith.addf %2, %3 : vector<1x1xf32>
    %c0_2 = arith.constant 0 : index
    %c0_3 = arith.constant 0 : index
    %5 = vector.load %arg1[%c0_2, %c0_3] : memref<1x64xf32, #tpu.memory_space<vmem>>, vector<1x64xf32>
    %c0_4 = arith.constant 0 : index
    %c0_5 = arith.constant 0 : index
    %6 = vector.load %arg0[%c0_4, %c0_5] : memref<64x32xf32, #tpu.memory_space<vmem>>, vector<64x32xf32>
    %cst_6 = arith.constant dense<0.000000e+00> : vector<1x32xf32>
    %7 = tpu.matmul %5, %6, %cst_6 {dimension_numbers = #tpu.dot_dimension_numbers<[1], [0], [0], [1], [0, 0, 1, 1], [], []>} : vector<1x64xf32>, vector<64x32xf32>, vector<1x32xf32> -> vector<1x32xf32>
    %8 = vector.broadcast %4 : vector<1x1xf32> to vector<1x32xf32>
    %9 = arith.divf %7, %8 : vector<1x32xf32>
    %c0_7 = arith.constant 0 : index
    %c0_8 = arith.constant 0 : index
    %10 = vector.load %arg2[%c0_7, %c0_8] : memref<32x32xf32, #tpu.memory_space<vmem>>, vector<32x32xf32>
    %cst_9 = arith.constant dense<0.000000e+00> : vector<1x32xf32>
    %11 = tpu.matmul %9, %10, %cst_9 {dimension_numbers = #tpu.dot_dimension_numbers<[1], [0], [0], [1], [0, 0, 1, 1], [], []>} : vector<1x32xf32>, vector<32x32xf32>, vector<1x32xf32> -> vector<1x32xf32>
    %c0_10 = arith.constant 0 : index
    %c0_11 = arith.constant 0 : index
    %12 = vector.load %arg3[%c0_10, %c0_11] : memref<1x32xf32, #tpu.memory_space<vmem>>, vector<1x32xf32>
    %13 = arith.addf %11, %12 : vector<1x32xf32>
    %14 = math.tanh %13 : vector<1x32xf32>
    %c0_12 = arith.constant 0 : index
    %c0_13 = arith.constant 0 : index
    %15 = vector.load %arg4[%c0_12, %c0_13] : memref<1x32xf32, #tpu.memory_space<vmem>>, vector<1x32xf32>
    tpu.vector_store %arg4[%c0_12, %c0_13], %14 {strides = array<i32>} : memref<1x32xf32, #tpu.memory_space<vmem>>, vector<1x32xf32>,
    return
  }
}

</mosaic_0001>

<bundles_post_ra>
// kernel: init_hidden_call.1
= control target key start
LH: loop header
LB: loop body
LE: loop exit
PB: predicated region body
PF: predicated region fallthrough
CT: control target
= control target key end

     0   :  { %v300_v3 = vmov 0.0|0.0   ;;  %vm301_vm0 = vmmov 0   ;;  %v302_v6 = vmov 0.0   ;;  %vm19_vm1 = vcmask 516096   ;;  %s383_s0 = inlined_call_operand.vmem [shape: f32[64,32], index: 0, kind: input, shape index: {}]   ;;  %s384_s1 = inlined_call_operand.vmem [shape: f32[1,64], index: 1, kind: input, shape index: {}]   ;;  %s385_s2 = inlined_call_operand.vmem [shape: f32[32,32], index: 2, kind: input, shape index: {}]   ;;  %s386_s3 = inlined_call_operand.vmem [shape: f32[1,32], index: 3, kind: input, shape index: {}]   ;;  %s387_s4 = inlined_call_operand.hbm [shape: f32[1,32], index: 4, kind: output, shape index: {}]  }
   0x1   :  { %v24_v0 = vld [vmem:[%s383_s0] sm:$0xff]  ;;  %v25_v1 = vld [vmem:[%s383_s0 + $0x8] sm:$0xff]  ;;  %v26_v2 = vld [vmem:[%s383_s0 + $0x10] sm:$0xff]  ;;  %250 = vmatprep.subr.bf16.mxu0 %v300_v3  ;;  %236 = vmatprep.mubr.msk.f32.mxu0 %vm301_vm0, %v302_v6 }
   0x2   :  { %v251_v4 = vpack.c.bf16 %v25_v1, %v24_v0  ;;  %v27_v5 = vld [vmem:[%s383_s0 + $0x18] sm:$0xff]  ;;  %v18_v7 = vld [vmem:[%s384_s1] sm:$0x1]  ;;  %262 = vmatprep.subr.bf16.mxu1 %v300_v3  ;;  %247 = vmatprep.mubr.msk.f32.mxu1 %vm301_vm0, %v302_v6 }
   0x3   :  { %v254_v8 = vpack.c.bf16 %v27_v5, %v26_v2  ;;  %v20_v9 = vsel %vm19_vm1, %v18_v7, 0.0 }
   0x4   :  { %252 = vmatpush3.bf16.msra.mxu0 %v251_v4 }
   0x5   :  { %9 = vsyncpa [#allocation3], 0  ;;  %253 = vmatprep.subr.bf16.mxu0 %v300_v3  ;;  %v28_v10 = vld [vmem:[%s383_s0 + $0x20] sm:$0xff]  ;;  %v29_v11 = vld [vmem:[%s383_s0 + $0x28] sm:$0xff]  ;;  %21 = vadd.xlane.f32.xlu0 %v20_v9  ;;  %vm32_vm2 = vcmask 523264   ;;  %vm113_vm3 = vcmask 261120  }
   0x6   :  { %v257_v12 = vpack.c.bf16 %v29_v11, %v28_v10  ;;  %v30_v13 = vld [vmem:[%s383_s0 + $0x30] sm:$0xff]  ;;  %v31_v14 = vld [vmem:[%s383_s0 + $0x38] sm:$0xff]  ;;  %v108_v16 = vld [vmem:[%s385_s2] sm:$0xff]  ;;  %vm188_vm4 = vcmask 253952  }
   0x7   :  { %v260_v15 = vpack.c.bf16 %v31_v14, %v30_v13  ;;  %v109_v17 = vld [vmem:[%s385_s2 + $0x8] sm:$0xff]  ;;  %v110_v19 = vld [vmem:[%s385_s2 + $0x10] sm:$0xff]  ;;  %v111_v20 = vld [vmem:[%s385_s2 + $0x18] sm:$0xff]  ;;  %s303_s2 = smov [#allocation2]  }
   0x8   :  { %255 = vmatpush3.bf16.msra.mxu0 %v254_v8  ;;  %v263_v18 = vpack.c.bf16 %v109_v17, %v108_v16  ;;  %v266_v21 = vpack.c.bf16 %v111_v20, %v110_v19  ;;  %v112_v28 = vld [vmem:[%s386_s3] sm:$0x1]  ;;  %s196_s15 = sshll.u32 %s303_s2, 4  ;;  %s197_s15 = int_to_ptr.vmem [resolvable:$true] %s196_s15 }
   0x9   :  { %256 = vmatprep.subr.bf16.mxu0 %v300_v3  ;;  %s276_s16 = scalar_lea.vmem %s197_s15, 16  ;;  %s280_s17 = scalar_lea.vmem %s197_s15, 32 }
   0xa   :  { %264 = vmatpush3.bf16.msra.mxu1 %v263_v18  ;;  %p277_p0 = scmp.ne.s32.totalorder %s197_s15, %s276_s16  ;;  %p281_p1 = scmp.lt.s32.totalorder %s197_s15, %s197_s15 }
   0xb   :  { %265 = vmatprep.subr.bf16.mxu1 %v300_v3  ;;  %p282_p2 = scmp.lt.s32.totalorder %s280_s17, %s276_s16 }
   0xc   :  { %258 = vmatpush3.bf16.msra.mxu0 %v257_v12 }
   0xd   :  { %259 = vmatprep.subr.bf16.mxu0 %v300_v3  ;;  %p283_p3 = por %p282_p2, %p281_p1 }
   0xe   :  { %267 = vmatpush3.bf16.msra.mxu1 %v266_v21 }
   0xf   :  { %p284_p4 = pnand %p283_p3, %p277_p0 }
  0x10   :  { %261 = vmatpush3.bf16.msra.mxu0 %v260_v15 }
  0x13   :  { %237 = vmatmul.mubr.msk.f32.vlgmr.msra.gmra.mrb[0].mxu0 %vm32_vm2, %v18_v7 }
  0x92   :  { %v22_v22 = vpop.xlane.xlu0 %21 }
  0x93   :  { %v23_v23 = vadd.f32 1e-08, %v22_v22 }
  0x95   :  { %272 = vrcp.f32 %v23_v23 }
  0x9f   :  { %v273_v24 = vpop.eup %272 }
  0xe6   :  { %v102_v25 = vpop.f32.mrb[0].mxu0 }
  0xe7   :  { %v107_v26 = vmul.f32 %v273_v24, %v102_v25  ;;  %v238_v27 = vpop.f32.mrb[1].mxu0 }
  0xe9   :  { %248 = vmatmul.mubr.msk.f32.vlgmr.msra.gmra.mrb[0].mxu1 %vm113_vm3, %v107_v26 }
 0x1bc   :  { %v183_v29 = vpop.f32.mrb[0].mxu1 }
 0x1bd   :  { %v184_v30 = vadd.f32 %v183_v29, %v112_v28  ;;  %v249_v31 = vpop.f32.mrb[1].mxu1 }
 0x1bf   :  { %274 = vtanh.f32 %v184_v30 }
 0x1c9   :  { %v275_v32 = vpop.eup %274 }
 0x1ca   :  { %189 = vst.msk [vmem:[#allocation2] sm:$0x1] %vm188_vm4, %v275_v32 }
 0x1cb   :  { %287 = shalt.err (!%p284_p4)
}
 0x1cc   :  { %s288_s19 = scalar_lea.hbm %s387_s4, 16 }
 0x1cd   :  { %p289_p5 = scmp.ne.s32.totalorder %s387_s4, %s288_s19  ;;  %p292_p6 = scmp.lt.u32.totalorder %s288_s19, %s387_s4 }
 0x1cf   :  { %p294_p7 = pnand %p292_p6, %p289_p5 }
 0x1d1   :  { %297 = shalt.err (!%p294_p7)
}
 0x1d2   :  { %199 = dma.vmem_to_hbm [thread:$0]  %s197_s15, 16, %s387_s4, [#allocation3]  }
 0x1d3   :  { %298 = dma.done.wait [#allocation3], 16  }
 0x1d4   :  { %299 = vsyncadd [#allocation3], 4294967280 }
 0x1d5   :  { %203 = vsyncpa [#allocation3], 1 }

</bundles_post_ra>
